<compile_context>
chip_gen: v5e
topology: v5e:2x2
jax: 0.10.0
libtpu: 0.0.40
codegen_flags: <defaults>
</compile_context>

<pallas_src>
import functools

import jax
import jax.numpy as jnp
from jax import lax
from jax.experimental import pallas as pl
from jax.experimental.pallas import tpu as pltpu


def _cdiv(a: int, b: int) -> int:
    return (a + b - 1) // b


def _round_up(n: int, m: int) -> int:
    return ((n + m - 1) // m) * m


def _make_mlp_kernel(num_hidden: int):
    """Fused MLP kernel: `num_hidden` Linear+ReLU layers + scalar head."""

    def kernel(*refs):
        # refs = [x, (W_i, b_i) * num_hidden, w_out_col, b_out_smem, o]
        x_ref = refs[0]                        # (tile, F)    input dtype (f32)
        w_out_ref = refs[1 + 2 * num_hidden]   # (h_last, 1)  f32 column, VMEM
        b_out_ref = refs[2 + 2 * num_hidden]   # (1,)         f32 scalar, SMEM
        o_ref = refs[3 + 2 * num_hidden]       # (1, tile)    lane-dense output

        # ---- layer 0: batch-on-lanes without transposing x ----------------
        w0_ref, b0_ref = refs[1], refs[2]      # (h0, F) bf16, (h0, 1) f32
        h = lax.dot_general(
            w0_ref[...], x_ref[...].astype(w0_ref.dtype),
            (((1,), (1,)), ((), ())),          # contract the feature axes (NT)
            preferred_element_type=jnp.float32)
        h = jnp.maximum(h + b0_ref[...], 0.0)  # bias (sublane col) + ReLU, f32
        # TODO(synk): Dropout is identity in eval mode; training-mode
        # scaled-Bernoulli masking is not implemented.

        # ---- remaining hidden layers (standard NN dims, batch on lanes) ---
        for li in range(1, num_hidden):
            w_ref = refs[1 + 2 * li]           # (h_li, h_{li-1}) bf16
            b_ref = refs[2 + 2 * li]           # (h_li, 1) f32
            h = lax.dot_general(
                w_ref[...], h.astype(w_ref.dtype),
                (((1,), (0,)), ((), ())),
                preferred_element_type=jnp.float32)
            h = jnp.maximum(h + b_ref[...], 0.0)

        # ---- head Linear(h_last -> 1): VPU mul + sublane (XLU) reduction --
        # Produces a lane-dense (1, tile) row directly; no N=1 MXU matmul.
        out = jnp.sum(h * w_out_ref[...], axis=0, keepdims=True) + b_out_ref[0]
        o_ref[...] = out.astype(o_ref.dtype)

    return kernel


@functools.partial(jax.jit,
                   static_argnames=("batch_tile", "compute_dtype", "training"))
def mlp_forward(x, params, *, batch_tile=1024, compute_dtype=jnp.bfloat16,
                training=False):
    """params = [(W0, b0), ..., (W_out, b_out)] in PyTorch layout:
       W_i: (out_features, in_features), b_i: (out_features,).
       Last layer has out_features = 1.  Returns (B, 1)."""
    if training:
        # TODO(synk): training-mode dropout not implemented in the kernel.
        raise NotImplementedError("mlp_forward implements eval-mode only "
                                  "(Dropout is the identity).")

    B, F = x.shape
    *hidden, (w_out, b_out) = params
    num_hidden = len(hidden)
    h_last = w_out.shape[-1]
    out_dtype = x.dtype

    # --- tile / grid selection -------------------------------------------
    # Batch lives on lanes in the output, so tiles are multiples of 128.
    # Guarantee >= 2 grid steps whenever B allows (v7x: both TensorCores).
    # VMEM use is < 1 MiB, so tile size is never VMEM-constrained.
    batch_tile = max(128, _round_up(batch_tile, 128))
    tile = min(batch_tile, max(128, _round_up(_cdiv(B, 2), 128)))
    grid = (_cdiv(B, tile),)

    # --- flatten inputs (x streamed natively; no wrapper cast / pad) ------
    flat_inputs = [x]
    in_specs = [pl.BlockSpec((tile, F), lambda i: (i, 0))]
    # Optional further tuning for single-TC v5e at very large B:
    #   pipeline_mode=pl.Buffered(3) on the x spec / batch_tile up to 2048.
    for (w, b) in hidden:
        dout, din = w.shape                              # PyTorch (out, in)
        flat_inputs.append(w.astype(compute_dtype))      # resident MXU operand
        flat_inputs.append(b.reshape(dout, 1).astype(jnp.float32))
        in_specs.append(pl.BlockSpec((dout, din), lambda i: (0, 0)))
        in_specs.append(pl.BlockSpec((dout, 1), lambda i: (0, 0)))

    # Head: weight as an (h_last, 1) f32 column for the sublane reduction,
    # bias as a single f32 scalar in SMEM.
    flat_inputs.append(w_out.reshape(h_last, 1).astype(jnp.float32))
    in_specs.append(pl.BlockSpec((h_last, 1), lambda i: (0, 0)))
    flat_inputs.append(b_out.reshape(1).astype(jnp.float32))
    in_specs.append(pl.BlockSpec(memory_space=pltpu.MemorySpace.SMEM))

    # Lane-dense output: a (1, tile) row per grid step.
    out_spec = pl.BlockSpec((1, tile), lambda i: (0, i))

    out_row = pl.pallas_call(
        _make_mlp_kernel(num_hidden),
        out_shape=jax.ShapeDtypeStruct((1, B), out_dtype),
        grid_spec=pltpu.PrefetchScalarGridSpec(
            num_scalar_prefetch=0,
            grid=grid,
            in_specs=in_specs,
            out_specs=out_spec,
        ),
        compiler_params=pltpu.CompilerParams(
            dimension_semantics=("parallel",),   # batch tiles over both v7x TCs
        ),
    )(*flat_inputs)

    return out_row.reshape(B, 1)                 # free XLA plumbing


def init_params(key, in_features, hidden_units):
    """Deterministic synthetic init, PyTorch layout: W (out, in), b (out,)."""
    dims = [in_features] + list(hidden_units) + [1]
    params = []
    for li in range(len(dims) - 1):
        key, kw, kb = jax.random.split(key, 3)
        bound = 1.0 / (dims[li] ** 0.5)
        w = jax.random.uniform(kw, (dims[li + 1], dims[li]),
                               minval=-bound, maxval=bound, dtype=jnp.float32)
        b = jax.random.uniform(kb, (dims[li + 1],),
                               minval=-bound, maxval=bound, dtype=jnp.float32)
        params.append((w, b))
    return params


def reference_forward(x, params, compute_dtype=jnp.float32):
    """Pure-JAX reference mirroring the kernel's math (dtype-matched)."""
    *hidden, (w_out, b_out) = params
    h = x.astype(jnp.float32)
    for (w, b) in hidden:
        h = jnp.dot(h.astype(compute_dtype), w.T.astype(compute_dtype),
                    preferred_element_type=jnp.float32)
        h = jnp.maximum(h + b.reshape(1, -1).astype(jnp.float32), 0.0)
    out = jnp.dot(h, w_out.T.astype(jnp.float32),
                  preferred_element_type=jnp.float32)
    return out + b_out.reshape(1, 1).astype(jnp.float32)


if __name__ == "__main__":
    # Network(in_features=16, hidden_units=[32, 32], dropout=0.1), eval mode.
    in_features = 16
    hidden_units = [32, 32]
    batch = 1024           # -> 2 grid steps of 512 rows (both v7x TCs active)

    key = jax.random.PRNGKey(0)
    key, kx = jax.random.split(key)
    x = jax.random.normal(kx, (batch, in_features), dtype=jnp.float32)
    params = init_params(key, in_features, hidden_units)

    out = jax.block_until_ready(mlp_forward(x, params))
    assert out.shape == (batch, 1), out.shape

    # Check against a dtype-matched (bf16-matmul, f32-accum) reference ...
    ref_bf16 = reference_forward(x, params, compute_dtype=jnp.bfloat16)
    assert jnp.allclose(out, ref_bf16, atol=1e-3, rtol=1e-3), "mismatch vs bf16 reference"
    # ... and sanity-check against full-f32 math (bf16 quantization tolerance).
    ref_f32 = reference_forward(x, params, compute_dtype=jnp.float32)
    assert jnp.allclose(out, ref_f32, atol=5e-2, rtol=5e-2), "mismatch vs f32 reference"

    # Ragged / small batch exercises the masked (oversized) last block path.
    x_small = x[:100]
    out_small = jax.block_until_ready(mlp_forward(x_small, params))
    assert out_small.shape == (100, 1), out_small.shape
    assert jnp.allclose(out_small, ref_bf16[:100], atol=1e-3, rtol=1e-3), "ragged mismatch"

    print("KERNEL_OK")
</pallas_src>

<mosaic_0001>
module attributes {stable_mosaic.version = 11 : i64} {
  func.func @kernel(%arg0: i32, %arg1: memref<512x16xf32, #tpu.memory_space<vmem>>, %arg2: memref<32x16xbf16, #tpu.memory_space<vmem>>, %arg3: memref<32x1xf32, #tpu.memory_space<vmem>>, %arg4: memref<32x32xbf16, #tpu.memory_space<vmem>>, %arg5: memref<32x1xf32, #tpu.memory_space<vmem>>, %arg6: memref<32x1xf32, #tpu.memory_space<vmem>>, %arg7: memref<1xf32, #tpu.memory_space<smem>>, %arg8: memref<1x512xf32, #tpu.memory_space<vmem>>) attributes {dimension_semantics = [#tpu.dimension_semantics<parallel>], iteration_bounds = array<i64: 2>, scalar_prefetch = 0 : i64, scratch_operands = 0 : i64, tpu.core_type = #tpu.core_type<tc>, window_params = [{transform_indices = @transform_0, window_bounds = array<i64: 512, 16>}, {pipeline_mode = #tpu.pipeline_mode<synchronous>, transform_indices = @transform_1, window_bounds = array<i64: 32, 16>}, {pipeline_mode = #tpu.pipeline_mode<synchronous>, transform_indices = @transform_2, window_bounds = array<i64: 32, 1>}, {pipeline_mode = #tpu.pipeline_mode<synchronous>, transform_indices = @transform_3, window_bounds = array<i64: 32, 32>}, {pipeline_mode = #tpu.pipeline_mode<synchronous>, transform_indices = @transform_4, window_bounds = array<i64: 32, 1>}, {pipeline_mode = #tpu.pipeline_mode<synchronous>, transform_indices = @transform_5, window_bounds = array<i64: 32, 1>}, {transform_indices = @transform_6, window_bounds = array<i64: 1>}, {transform_indices = @transform_7, window_bounds = array<i64: 1, 512>}]} {
    %c0 = arith.constant 0 : index
    %c0_0 = arith.constant 0 : index
    %0 = vector.load %arg2[%c0, %c0_0] : memref<32x16xbf16, #tpu.memory_space<vmem>>, vector<32x16xbf16>
    %c0_1 = arith.constant 0 : index
    %c0_2 = arith.constant 0 : index
    %1 = vector.load %arg1[%c0_1, %c0_2] : memref<512x16xf32, #tpu.memory_space<vmem>>, vector<512x16xf32>
    %2 = arith.truncf %1 : vector<512x16xf32> to vector<512x16xbf16>
    %cst = arith.constant dense<0.000000e+00> : vector<32x512xf32>
    %3 = tpu.matmul %0, %2, %cst {dimension_numbers = #tpu.dot_dimension_numbers<[1], [1], [0], [0], [0, 0, 1, 0], [], []>} : vector<32x16xbf16>, vector<512x16xbf16>, vector<32x512xf32> -> vector<32x512xf32>
    %c0_3 = arith.constant 0 : index
    %c0_4 = arith.constant 0 : index
    %4 = vector.load %arg3[%c0_3, %c0_4] : memref<32x1xf32, #tpu.memory_space<vmem>>, vector<32x1xf32>
    %5 = vector.broadcast %4 : vector<32x1xf32> to vector<32x512xf32>
    %6 = arith.addf %3, %5 : vector<32x512xf32>
    %cst_5 = arith.constant 0.000000e+00 : f32
    %7 = vector.broadcast %cst_5 : f32 to vector<32x512xf32>
    %8 = arith.maximumf %6, %7 : vector<32x512xf32>
    %c0_6 = arith.constant 0 : index
    %c0_7 = arith.constant 0 : index
    %9 = vector.load %arg4[%c0_6, %c0_7] : memref<32x32xbf16, #tpu.memory_space<vmem>>, vector<32x32xbf16>
    %10 = arith.truncf %8 : vector<32x512xf32> to vector<32x512xbf16>
    %cst_8 = arith.constant dense<0.000000e+00> : vector<32x512xf32>
    %11 = tpu.matmul %9, %10, %cst_8 {dimension_numbers = #tpu.dot_dimension_numbers<[1], [0], [0], [1], [0, 0, 1, 1], [], []>} : vector<32x32xbf16>, vector<32x512xbf16>, vector<32x512xf32> -> vector<32x512xf32>
    %c0_9 = arith.constant 0 : index
    %c0_10 = arith.constant 0 : index
    %12 = vector.load %arg5[%c0_9, %c0_10] : memref<32x1xf32, #tpu.memory_space<vmem>>, vector<32x1xf32>
    %13 = vector.broadcast %12 : vector<32x1xf32> to vector<32x512xf32>
    %14 = arith.addf %11, %13 : vector<32x512xf32>
    %cst_11 = arith.constant 0.000000e+00 : f32
    %15 = vector.broadcast %cst_11 : f32 to vector<32x512xf32>
    %16 = arith.maximumf %14, %15 : vector<32x512xf32>
    %c0_12 = arith.constant 0 : index
    %c0_13 = arith.constant 0 : index
    %17 = vector.load %arg6[%c0_12, %c0_13] : memref<32x1xf32, #tpu.memory_space<vmem>>, vector<32x1xf32>
    %18 = vector.broadcast %17 : vector<32x1xf32> to vector<32x512xf32>
    %19 = arith.mulf %16, %18 : vector<32x512xf32>
    %cst_14 = arith.constant dense<0.000000e+00> : vector<512xf32>
    %20 = vector.multi_reduction <add>, %19, %cst_14 [0] : vector<32x512xf32> to vector<512xf32>
    %21 = vector.shape_cast %20 : vector<512xf32> to vector<1x512xf32>
    %c0_15 = arith.constant 0 : index
    %22 = memref.load %arg7[%c0_15] : memref<1xf32, #tpu.memory_space<smem>>
    %23 = vector.broadcast %22 : f32 to vector<1x512xf32>
    %24 = arith.addf %21, %23 : vector<1x512xf32>
    %c0_16 = arith.constant 0 : index
    %c0_17 = arith.constant 0 : index
    %25 = vector.load %arg8[%c0_16, %c0_17] : memref<1x512xf32, #tpu.memory_space<vmem>>, vector<1x512xf32>
    tpu.vector_store %arg8[%c0_16, %c0_17], %24 {strides = array<i32>} : memref<1x512xf32, #tpu.memory_space<vmem>>, vector<1x512xf32>,
    return
  }
  func.func @transform_0(%arg0: i32) -> (i32, i32) {
    %c0_i32 = arith.constant 0 : i32
    %c0_i32_0 = arith.constant 0 : i32
    return %arg0, %c0_i32 : i32, i32
  }
  func.func @transform_1(%arg0: i32) -> (i32, i32) {
    %c0_i32 = arith.constant 0 : i32
    %c0_i32_0 = arith.constant 0 : i32
    %c0_i32_1 = arith.constant 0 : i32
    return %c0_i32, %c0_i32_0 : i32, i32
  }
  func.func @transform_2(%arg0: i32) -> (i32, i32) {
    %c0_i32 = arith.constant 0 : i32
    %c0_i32_0 = arith.constant 0 : i32
    %c0_i32_1 = arith.constant 0 : i32
    return %c0_i32, %c0_i32_0 : i32, i32
  }
  func.func @transform_3(%arg0: i32) -> (i32, i32) {
    %c0_i32 = arith.constant 0 : i32
    %c0_i32_0 = arith.constant 0 : i32
    %c0_i32_1 = arith.constant 0 : i32
    return %c0_i32, %c0_i32_0 : i32, i32
  }
  func.func @transform_4(%arg0: i32) -> (i32, i32) {
    %c0_i32 = arith.constant 0 : i32
    %c0_i32_0 = arith.constant 0 : i32
    %c0_i32_1 = arith.constant 0 : i32
    return %c0_i32, %c0_i32_0 : i32, i32
  }
  func.func @transform_5(%arg0: i32) -> (i32, i32) {
    %c0_i32 = arith.constant 0 : i32
    %c0_i32_0 = arith.constant 0 : i32
    %c0_i32_1 = arith.constant 0 : i32
    return %c0_i32, %c0_i32_0 : i32, i32
  }
  func.func @transform_6(%arg0: i32) -> i32 {
    %c0_i32 = arith.constant 0 : i32
    %c0_i32_0 = arith.constant 0 : i32
    return %c0_i32 : i32
  }
  func.func @transform_7(%arg0: i32) -> (i32, i32) {
    %c0_i32 = arith.constant 0 : i32
    %c0_i32_0 = arith.constant 0 : i32
    return %c0_i32, %arg0 : i32, i32
  }
}

</mosaic_0001>

<bundles_post_ra>
// kernel: mlp_forward.1
= control target key start
LH: loop header
LB: loop body
LE: loop exit
PB: predicated region body
PF: predicated region fallthrough
CT: control target
= control target key end

     0   :  { %s1386_s0 = inlined_call_operand.vmem [shape: f32[1024,16], index: 0, kind: input, shape index: {}]   ;;  %s1387_s1 = inlined_call_operand.vmem [shape: bf16[32,16], index: 1, kind: input, shape index: {}]   ;;  %s1388_s2 = inlined_call_operand.vmem [shape: f32[32,1], index: 2, kind: input, shape index: {}]   ;;  %s1389_s3 = inlined_call_operand.vmem [shape: bf16[32,32], index: 3, kind: input, shape index: {}]   ;;  %s1390_s4 = inlined_call_operand.vmem [shape: f32[32,1], index: 4, kind: input, shape index: {}]   ;;  %s1391_s5 = inlined_call_operand.vmem [shape: f32[32,1], index: 5, kind: input, shape index: {}]   ;;  %s1392_s6 = inlined_call_operand.<no memory space> [shape: f32[1], index: 6, kind: input, shape index: {}]   ;;  %s1393_s7 = inlined_call_operand.hbm [shape: f32[1,1024], index: 7, kind: output, shape index: {}]  }
   0x1   :  { %12 = sst [smem:[#allocation2]] %s1392_s6 }
   0x2   :  { %13 = vsyncpa [#allocation4], 0 }
   0x3   :  { %15 = vsyncpa [#allocation4 + $0x1], 0  ;;  %s1130_s26 = smov 0   ;;  %s1132_s27 = smov 0  }
   0x4   :  { %s1134_s28 = smov 0   ;;  %s1136_s29 = smov 0  }
   0x5 LB: > { %s1151_s6 = sadd.s32 4294967295, %s1084_s29   ;;  %s932_s30 = sadd.s32 4294967294, %s1084_s29   ;;  %s1084_s29 = sphi %s1136_s29, %s1399_s29   ;;  %s1080_s28 = sphi %s1134_s28, %s1398_s28   ;;  %s1076_s27 = sphi %s1132_s27, %s1397_s27   ;;  %s1072_s26 = sphi %s1130_s26, %s1396_s26  }
   0x6   : > { %s1155_s8 = sadd.s32 1, %s1084_s29   ;;  %s180_s9 = sadd.s32 1, %s1080_s28 }
   0x7   : > { %s177_s10 = ssub.s32 %s1084_s29, %s1155_s8  ;;  %p190_p0 = scmp.ne.s32.totalorder %s1080_s28, %s1076_s27 }
   0x8   : > { %p178_p1 = scmp.eq.s32.totalorder %s177_s10, 0  ;;  %p191_p2 = scmp.eq.s32.totalorder %s1151_s6, 1 }
   0x9   : > { %p196_p3 = scmp.ne.s32.totalorder %s1076_s27, %s1072_s26  ;;  %p197_p4 = scmp.eq.s32.totalorder %s932_s30, 1 }
   0xa   : > { %s1166_s11 = scalar_select %p178_p1, %s1080_s28, %s180_s9  }
   0xb   : > { %p1168_p5 = por %p191_p2, %p190_p0  ;;  %p1172_p6 = por %p197_p4, %p196_p3 }
   0xc   : > { %p935_p7 = scmp.ge.s32.totalorder %s1084_s29, 1  ;;  %p242_p8 = scmp.lt.s32.totalorder %s1084_s29, 3 }
   0xe   : > { %p243_p9 = pnand %p935_p7, %p242_p8 }
   0xf   : > { %s937_s14 = sshll.u32 (!%p243_p9), %s1151_s6, 6  ;;  %s832_s21 = sld [smem:[#allocation2]] (!%p243_p9) }
  0x10   : > { %246 = sbr.rel (%p243_p9) target bundleno = 448 (0x1c0), region = 48  ;;  %p275_p10 = scmp.lt.s32.totalorder (!%p243_p9), %s937_s14, 127 }
  0x11   : > { %s271_s22 = sand.u32 (!%p243_p9), 1, %s1076_s27   ;;  %s972_s24 = sshll.u32 (!%p243_p9), %s1151_s6, 2 }
  0x12   : > { %s936_s23 = sshll.u32 (!%p243_p9), %s271_s22, 2  ;;  %s868_s9 = scalar_lea.hbm (!%p243_p9), %s1393_s7, %s972_s24 }
  0x13   : > { %s273_s10 = scalar_lea.vmem (!%p243_p9), [#allocation3], %s936_s23  ;;  %s872_s6 = sshll.u32 (!%p243_p9), %s868_s9, 4  ;;  %s873_s6 = int_to_ptr.hbm [resolvable:$true] %s872_s6 }
  0x14   : > { %s1036_s16 = sshra.s32 (!%p243_p9), %s873_s6, 4  ;;  %s1042_s20 = scalar_lea.hbm (!%p243_p9), %s1393_s7, 8  ;;  %s1037_s16 = int_to_ptr.hbm [resolvable:$true] %s1036_s16 }
  0x15   : > { %s1401_s14 = smov (!%p275_p10, %s937_s14), 127  ;;  %vm416_vm0 = vcmask 130048   ;;  %vm657_vm1 = vcmask 261120   ;;  %vm845_vm2 = vcmask 1040384   ;;  %vm847_vm3 = vcmask 1042434   ;;  %s1038_s17 = scalar_lea.hbm %s1037_s16, 4 }
  0x16   : > { %s938_s15 = sshll.u32 %s1401_s14, 3  ;;  %s870_s14 = sshll.u32 %s273_s10, 4  ;;  %vm849_vm4 = vcmask 1041408   ;;  %s871_s14 = int_to_ptr.vmem [resolvable:$true] %s870_s14 }
  0x17   : > { %s1182_s18 = scalar_lea.vmem %s1386_s0, %s938_s15  ;;  %s858_s15 = scalar_lea.sflag [#allocation4], %s271_s22 }
  0x18   : > { %v300_v0 = vld [vmem:[%s1182_s18 + $0x70] sm:$0xff]  ;;  %v301_v1 = vld [vmem:[%s1182_s18 + $0x78] sm:$0xff]  ;;  %v298_v11 = vld [vmem:[%s1182_s18 + $0x60] sm:$0xff]  ;;  %p1039_p11 = scmp.ne.s32.totalorder %s1037_s16, %s1038_s17  ;;  %p1043_p0 = scmp.lt.s32.totalorder %s1037_s16, %s1393_s7 }
  0x19   : > { %v316_v2 = vld [vmem:[%s1182_s18 + $0xf0] sm:$0xff]  ;;  %v357_v3 = vpack.c.bf16 %v301_v1, %v300_v0  ;;  %v317_v4 = vld [vmem:[%s1182_s18 + $0xf8] sm:$0xff]  ;;  %v299_v14 = vld [vmem:[%s1182_s18 + $0x68] sm:$0xff]  ;;  %p1044_p1 = scmp.lt.s32.totalorder %s1042_s20, %s1038_s17 }
  0x1a   : > { %v332_v5 = vld [vmem:[%s1182_s18 + $0x170] sm:$0xff]  ;;  %v333_v6 = vld [vmem:[%s1182_s18 + $0x178] sm:$0xff]  ;;  %v365_v7 = vpack.c.bf16 %v317_v4, %v316_v2  ;;  %v314_v15 = vld [vmem:[%s1182_s18 + $0xe0] sm:$0xff]  ;;  %v356_v23 = vpack.c.bf16 %v299_v14, %v298_v11  ;;  %p1040_p12 = pnand %p1039_p11, %p1168_p5 }
  0x1b   : > { %v373_v8 = vpack.c.bf16 %v333_v6, %v332_v5  ;;  %v348_v9 = vld [vmem:[%s1182_s18 + $0x1f0] sm:$0xff]  ;;  %v349_v10 = vld [vmem:[%s1182_s18 + $0x1f8] sm:$0xff]  ;;  %v445_v12 = vsel %vm416_vm0, %v357_v3, 0  ;;  %v315_v16 = vld [vmem:[%s1182_s18 + $0xe8] sm:$0xff]  ;;  %p1045_p2 = por %p1044_p1, %p1043_p0 }
  0x1c   : > { %v381_v13 = vpack.c.bf16 %v349_v10, %v348_v9  ;;  %519 = vmatpush.bf16.xpose.msra.mxu0 %v445_v12  ;;  %v469_v17 = vsel %vm416_vm0, %v365_v7, 0  ;;  %v330_v19 = vld [vmem:[%s1182_s18 + $0x160] sm:$0xff]  ;;  %v331_v20 = vld [vmem:[%s1182_s18 + $0x168] sm:$0xff]  ;;  %v364_v25 = vpack.c.bf16 %v315_v16, %v314_v15  ;;  %v442_v28 = vsel %vm416_vm0, %v356_v23, 0  ;;  %v296_v31 = vld [vmem:[%s1182_s18 + $0x50] sm:$0xff]  ;;  %p1041_p13 = pneg %p1040_p12 }
  0x1d   : > { %v493_v18 = vsel %vm416_vm0, %v373_v8, 0  ;;  %v346_v21 = vld [vmem:[%s1182_s18 + $0x1e0] sm:$0xff]  ;;  %538 = vmatpush.bf16.xpose.msra.mxu1 %v469_v17  ;;  %v347_v24 = vld [vmem:[%s1182_s18 + $0x1e8] sm:$0xff]  ;;  %v372_v26 = vpack.c.bf16 %v331_v20, %v330_v19  ;;  %v297_v32 = vld [vmem:[%s1182_s18 + $0x58] sm:$0xff] }
  0x1e   : > { %557 = vmatpush.bf16.xpose.msra.mxu2 %v493_v18  ;;  %v517_v22 = vsel %vm416_vm0, %v381_v13, 0  ;;  %v380_v27 = vpack.c.bf16 %v347_v24, %v346_v21  ;;  %v466_v29 = vsel %vm416_vm0, %v364_v25, 0  ;;  %v312_v33 = vld [vmem:[%s1182_s18 + $0xd0] sm:$0xff]  ;;  %v313_v35 = vld [vmem:[%s1182_s18 + $0xd8] sm:$0xff]  ;;  %v355_v40 = vpack.c.bf16 %v297_v32, %v296_v31  ;;  %v294_v47 = vld [vmem:[%s1182_s18 + $0x40] sm:$0xff]  ;;  %p1046_p3 = pnand %p1045_p2, %p1041_p13 }
  0x1f   : > { %576 = vmatpush.bf16.xpose.msra.mxu3 %v517_v22  ;;  %v490_v30 = vsel %vm416_vm0, %v372_v26, 0  ;;  %v328_v36 = vld [vmem:[%s1182_s18 + $0x150] sm:$0xff]  ;;  %v329_v37 = vld [vmem:[%s1182_s18 + $0x158] sm:$0xff]  ;;  %v363_v41 = vpack.c.bf16 %v313_v35, %v312_v33  ;;  %v295_v48 = vld [vmem:[%s1182_s18 + $0x48] sm:$0xff] }
  0x20   : > { %v514_v34 = vsel %vm416_vm0, %v380_v27, 0  ;;  %v344_v38 = vld [vmem:[%s1182_s18 + $0x1d0] sm:$0xff]  ;;  %v345_v39 = vld [vmem:[%s1182_s18 + $0x1d8] sm:$0xff]  ;;  %v371_v42 = vpack.c.bf16 %v329_v37, %v328_v36  ;;  %v439_v44 = vsel %vm416_vm0, %v355_v40, 0  ;;  %v310_v49 = vld [vmem:[%s1182_s18 + $0xc0] sm:$0xff]  ;;  %v354_v56 = vpack.c.bf16 %v295_v48, %v294_v47 }
  0x21   : > { %v379_v43 = vpack.c.bf16 %v345_v39, %v344_v38  ;;  %v463_v45 = vsel %vm416_vm0, %v363_v41, 0  ;;  %v311_v51 = vld [vmem:[%s1182_s18 + $0xc8] sm:$0xff]  ;;  %v326_v52 = vld [vmem:[%s1182_s18 + $0x140] sm:$0xff]  ;;  %v292_v63 = vld [vmem:[%s1182_s18 + $0x30] sm:$0xff] }
  0x22   : > { %v487_v46 = vsel %vm416_vm0, %v371_v42, 0  ;;  %v327_v53 = vld [vmem:[%s1182_s18 + $0x148] sm:$0xff]  ;;  %v342_v54 = vld [vmem:[%s1182_s18 + $0x1c0] sm:$0xff]  ;;  %v362_v57 = vpack.c.bf16 %v311_v51, %v310_v49  ;;  %v436_v60 = vsel %vm416_vm0, %v354_v56, 0  ;;  %v293_v0 = vld [vmem:[%s1182_s18 + $0x38] sm:$0xff] }
  0x23   : > { %v511_v50 = vsel %vm416_vm0, %v379_v43, 0  ;;  %v343_v55 = vld [vmem:[%s1182_s18 + $0x1c8] sm:$0xff]  ;;  %v370_v58 = vpack.c.bf16 %v327_v53, %v326_v52  ;;  %v308_v1 = vld [vmem:[%s1182_s18 + $0xb0] sm:$0xff]  ;;  %v309_v3 = vld [vmem:[%s1182_s18 + $0xb8] sm:$0xff]  ;;  %v353_v8 = vpack.c.bf16 %v293_v0, %v292_v63 }
  0x24   : > { %520 = vmatpush.bf16.xpose.msra.mxu0 %v442_v28  ;;  %v378_v59 = vpack.c.bf16 %v343_v55, %v342_v54  ;;  %v460_v61 = vsel %vm416_vm0, %v362_v57, 0  ;;  %v324_v4 = vld [vmem:[%s1182_s18 + $0x130] sm:$0xff]  ;;  %v325_v5 = vld [vmem:[%s1182_s18 + $0x138] sm:$0xff]  ;;  %v361_v9 = vpack.c.bf16 %v309_v3, %v308_v1  ;;  %v290_v15 = vld [vmem:[%s1182_s18 + $0x20] sm:$0xff] }
  0x25   : > { %539 = vmatpush.bf16.xpose.msra.mxu1 %v466_v29  ;;  %v484_v62 = vsel %vm416_vm0, %v370_v58, 0  ;;  %v340_v6 = vld [vmem:[%s1182_s18 + $0x1b0] sm:$0xff]  ;;  %v341_v7 = vld [vmem:[%s1182_s18 + $0x1b8] sm:$0xff]  ;;  %v369_v10 = vpack.c.bf16 %v325_v5, %v324_v4  ;;  %v433_v12 = vsel %vm416_vm0, %v353_v8, 0  ;;  %v291_v16 = vld [vmem:[%s1182_s18 + $0x28] sm:$0xff]  ;;  %v1086_v29 = vmov 0  }
  0x26   : > { %558 = vmatpush.bf16.xpose.msra.mxu2 %v490_v30  ;;  %v508_v2 = vsel %vm416_vm0, %v378_v59, 0  ;;  %v377_v11 = vpack.c.bf16 %v341_v7, %v340_v6  ;;  %v457_v13 = vsel %vm416_vm0, %v361_v9, 0  ;;  %v306_v17 = vld [vmem:[%s1182_s18 + $0xa0] sm:$0xff]  ;;  %v307_v19 = vld [vmem:[%s1182_s18 + $0xa8] sm:$0xff]  ;;  %v352_v24 = vpack.c.bf16 %v291_v16, %v290_v15  ;;  %v384_v25 = vld [vmem:[%s1388_s2 + $0x10] sm:$0xff]  ;;  %1019 = vset.pattern.permute.xlu0 %v1086_v29 }
  0x27   : > { %577 = vmatpush.bf16.xpose.msra.mxu3 %v514_v34  ;;  %v481_v14 = vsel %vm416_vm0, %v369_v10, 0  ;;  %v322_v20 = vld [vmem:[%s1182_s18 + $0x120] sm:$0xff]  ;;  %v323_v21 = vld [vmem:[%s1182_s18 + $0x128] sm:$0xff]  ;;  %v360_v27 = vpack.c.bf16 %v307_v19, %v306_v17  ;;  %398 = vperm.xlu0 %1019, %v384_v25   ;;  %v288_v34 = vld [vmem:[%s1182_s18 + $0x10] sm:$0xff] }
  0x28   : > { %v505_v18 = vsel %vm416_vm0, %v377_v11, 0  ;;  %v338_v22 = vld [vmem:[%s1182_s18 + $0x1a0] sm:$0xff]  ;;  %v339_v23 = vld [vmem:[%s1182_s18 + $0x1a8] sm:$0xff]  ;;  %v368_v28 = vpack.c.bf16 %v323_v21, %v322_v20  ;;  %1020 = vset.pattern.permute.xlu1 %v1086_v29  ;;  %1021 = vset.pattern.permute.xlu2 %v1086_v29  ;;  %v430_v31 = vsel %vm416_vm0, %v352_v24, 0  ;;  %v289_v35 = vld [vmem:[%s1182_s18 + $0x18] sm:$0xff] }
  0x29   : > { %v382_v26 = vld [vmem:[%s1388_s2] sm:$0xff]  ;;  %v376_v30 = vpack.c.bf16 %v339_v23, %v338_v22  ;;  %v454_v32 = vsel %vm416_vm0, %v360_v27, 0  ;;  %v304_v36 = vld [vmem:[%s1182_s18 + $0x90] sm:$0xff]  ;;  %v305_v38 = vld [vmem:[%s1182_s18 + $0x98] sm:$0xff]  ;;  %v351_v43 = vpack.c.bf16 %v289_v35, %v288_v34 }
  0x2a   : > { %388 = vperm.xlu1 %1020, %v382_v26   ;;  %v478_v33 = vsel %vm416_vm0, %v368_v28, 0  ;;  %v320_v39 = vld [vmem:[%s1182_s18 + $0x110] sm:$0xff]  ;;  %v321_v40 = vld [vmem:[%s1182_s18 + $0x118] sm:$0xff]  ;;  %v287_v51 = vld [vmem:[%s1182_s18 + $0x8] sm:$0xff] }
  0x2b   : > { %v502_v37 = vsel %vm416_vm0, %v376_v30, 0  ;;  %v336_v41 = vld [vmem:[%s1182_s18 + $0x190] sm:$0xff]  ;;  %v337_v42 = vld [vmem:[%s1182_s18 + $0x198] sm:$0xff]  ;;  %v427_v47 = vsel %vm416_vm0, %v351_v43, 0  ;;  %v302_v52 = vld [vmem:[%s1182_s18 + $0x80] sm:$0xff] }
  0x2c   : > { %521 = vmatpush.bf16.xpose.msra.mxu0 %v439_v44  ;;  %v359_v44 = vpack.c.bf16 %v305_v38, %v304_v36  ;;  %v303_v54 = vld [vmem:[%s1182_s18 + $0x88] sm:$0xff]  ;;  %v318_v55 = vld [vmem:[%s1182_s18 + $0x100] sm:$0xff]  ;;  %v625_v5 = vld [vmem:[%s1390_s4 + $0x10] sm:$0xff] }
  0x2d   : > { %540 = vmatpush.bf16.xpose.msra.mxu1 %v463_v45  ;;  %v367_v45 = vpack.c.bf16 %v321_v40, %v320_v39  ;;  %v319_v56 = vld [vmem:[%s1182_s18 + $0x108] sm:$0xff]  ;;  %v334_v57 = vld [vmem:[%s1182_s18 + $0x180] sm:$0xff]  ;;  %v626_v6 = vld [vmem:[%s1390_s4 + $0x18] sm:$0xff] }
  0x2e   : > { %559 = vmatpush.bf16.xpose.msra.mxu2 %v487_v46  ;;  %v375_v46 = vpack.c.bf16 %v337_v42, %v336_v41  ;;  %v451_v48 = vsel %vm416_vm0, %v359_v44, 0  ;;  %v335_v58 = vld [vmem:[%s1182_s18 + $0x188] sm:$0xff]  ;;  %v366_v63 = vpack.c.bf16 %v319_v56, %v318_v55  ;;  %v975_v7 = vld [vmem:[%s1387_s1] sm:$0xff]  ;;  %v758_v9 = vld [vmem:[%s1391_s5 + $0x10] sm:$0xff] }
  0x2f   : > { %578 = vmatpush.bf16.xpose.msra.mxu3 %v511_v50  ;;  %v475_v49 = vsel %vm416_vm0, %v367_v45, 0  ;;  %v286_v50 = vld [vmem:[%s1182_s18] sm:$0xff]  ;;  %v374_v0 = vpack.c.bf16 %v335_v58, %v334_v57  ;;  %v757_v8 = vld [vmem:[%s1391_s5 + $0x8] sm:$0xff] }
  0x30   : > { %v499_v53 = vsel %vm416_vm0, %v375_v46, 0  ;;  %v350_v59 = vpack.c.bf16 %v287_v51, %v286_v50  ;;  %v472_v3 = vsel %vm416_vm0, %v366_v63, 0  ;;  %v976_v10 = vld [vmem:[%s1387_s1 + $0x8] sm:$0xff] }
  0x31   : > { %v496_v4 = vsel %vm416_vm0, %v374_v0, 0 }
  0x32   : > { %v424_v1 = vsel %vm416_vm0, %v350_v59, 0 }
  0x34   : > { %522 = vmatpush.bf16.xpose.msra.mxu0 %v436_v60  ;;  %v385_v60 = vld [vmem:[%s1388_s2 + $0x18] sm:$0xff] }
  0x35   : > { %541 = vmatpush.bf16.xpose.msra.mxu1 %v460_v61  ;;  %v383_v61 = vld [vmem:[%s1388_s2 + $0x8] sm:$0xff]  ;;  %403 = vperm.xlu0 %1019, %v385_v60  }
  0x36   : > { %560 = vmatpush.bf16.xpose.msra.mxu2 %v484_v62  ;;  %v358_v62 = vpack.c.bf16 %v303_v54, %v302_v52  ;;  %393 = vperm.xlu1 %1020, %v383_v61   ;;  %v977_v61 = vld [vmem:[%s1389_s3] sm:$0xff] }
  0x37   : > { %579 = vmatpush.bf16.xpose.msra.mxu3 %v508_v2 }
  0x38   : > { %v448_v2 = vsel %vm416_vm0, %v358_v62, 0 }
  0x3c   : > { %523 = vmatpush.bf16.xpose.msra.mxu0 %v433_v12 }
  0x3d   : > { %542 = vmatpush.bf16.xpose.msra.mxu1 %v457_v13  ;;  %639 = vperm.xlu0 %1019, %v625_v5   ;;  %v624_v5 = vld [vmem:[%s1390_s4 + $0x8] sm:$0xff] }
  0x3e   : > { %561 = vmatpush.bf16.xpose.msra.mxu2 %v481_v14  ;;  %644 = vperm.xlu1 %1020, %v626_v6  }
  0x3f   : > { %580 = vmatpush.bf16.xpose.msra.mxu3 %v505_v18 }
  0x44   : > { %524 = vmatpush.bf16.xpose.msra.mxu0 %v430_v31 }
  0x45   : > { %543 = vmatpush.bf16.xpose.msra.mxu1 %v454_v32  ;;  %767 = vperm.xlu0 %1019, %v757_v8  }
  0x46   : > { %562 = vmatpush.bf16.xpose.msra.mxu2 %v478_v33  ;;  %772 = vperm.xlu1 %1020, %v758_v9  }
  0x47   : > { %581 = vmatpush.bf16.xpose.msra.mxu3 %v502_v37 }
  0x4c   : > { %525 = vmatpush.bf16.xpose.msra.mxu0 %v427_v47 }
  0x4d   : > { %544 = vmatpush.bf16.xpose.msra.mxu1 %v451_v48  ;;  %v623_v48 = vld [vmem:[%s1390_s4] sm:$0xff] }
  0x4e   : > { %563 = vmatpush.bf16.xpose.msra.mxu2 %v475_v49  ;;  %629 = vperm.xlu2 %1021, %v623_v48  }
  0x4f   : > { %582 = vmatpush.bf16.xpose.msra.mxu3 %v499_v53 }
  0x54   : > { %526 = vmatpush.bf16.xpose.msra.mxu0 %v424_v1 }
  0x55   : > { %545 = vmatpush.bf16.xpose.msra.mxu1 %v448_v2 }
  0x56   : > { %564 = vmatpush.bf16.xpose.msra.mxu2 %v472_v3  ;;  %634 = vperm.xlu2 %1021, %v624_v5  }
  0x57   : > { %583 = vmatpush.bf16.xpose.msra.mxu3 %v496_v4 }
  0x5b   : > { %947 = vmatmul.msk.bf16.vlgmr.msra.gmra.mxu0 %vm416_vm0, %v975_v7 }
  0x5c   : > { %949 = vmatmul.msk.bf16.vlgmr.msra.gmra.mxu1 %vm416_vm0, %v975_v7 }
  0x5d   : > { %951 = vmatmul.msk.bf16.vlgmr.msra.gmra.mxu2 %vm416_vm0, %v975_v7 }
  0x5e   : > { %953 = vmatmul.msk.bf16.vlgmr.msra.gmra.mxu3 %vm416_vm0, %v975_v7 }
  0x6b   : > { %948 = vmatmul.msk.bf16.gmra.mxu0 %vm416_vm0, %v976_v10 }
  0x6c   : > { %950 = vmatmul.msk.bf16.gmra.mxu1 %vm416_vm0, %v976_v10 }
  0x6d   : > { %952 = vmatmul.msk.bf16.gmra.mxu2 %vm416_vm0, %v976_v10 }
  0x6e   : > { %954 = vmatmul.msk.bf16.gmra.mxu3 %vm416_vm0, %v976_v10  ;;  %v756_v10 = vld [vmem:[%s1391_s5] sm:$0xff] }
  0x6f   : > { %762 = vperm.xlu2 %1021, %v756_v10  }
  0x99   : > { %v399_v17 = vpop.permute.xlu0 %398 }
  0x9c   : > { %v389_v18 = vpop.permute.xlu1 %388 }
  0xa7   : > { %v404_v23 = vpop.permute.xlu0 %403 }
  0xa8   : > { %v394_v24 = vpop.permute.xlu1 %393 }
  0xd8   : > { %v528_v11 = vpop.f32.mrf.mxu0 }
  0xd9   : > { %v547_v12 = vpop.f32.mrf.mxu1  ;;  %v529_v32 = vadd.f32 %v528_v11, %v389_v18  ;;  %v978_v11 = vld [vmem:[%s1389_s3 + $0x8] sm:$0xff] }
  0xda   : > { %v548_v35 = vadd.f32 %v547_v12, %v389_v18  ;;  %v759_v12 = vld [vmem:[%s1391_s5 + $0x18] sm:$0xff] }
  0xdb   : > { %v595_v42 = vmax.f32 %v529_v32, 0.0  ;;  %777 = vperm.xlu2 %1021, %v759_v12  }
  0xdc   : > { %v596_v46 = vmax.f32 %v548_v35, 0.0 }
  0xe0   : > { %v566_v13 = vpop.f32.mrf.mxu2  ;;  %v530_v15 = vpop.f32.mrf.mxu0 }
  0xe1   : > { %v585_v14 = vpop.f32.mrf.mxu3  ;;  %v549_v16 = vpop.f32.mrf.mxu1  ;;  %v531_v33 = vadd.f32 %v530_v15, %v394_v24  ;;  %v567_v57 = vadd.f32 %v566_v13, %v389_v18 }
  0xe2   : > { %v550_v36 = vadd.f32 %v549_v16, %v394_v24  ;;  %v586_v62 = vadd.f32 %v585_v14, %v389_v18  ;;  %v630_v13 = vpop.permute.xlu2 %629 }
  0xe3   : > { %v599_v43 = vmax.f32 %v531_v33, 0.0  ;;  %v597_v6 = vmax.f32 %v567_v57, 0.0 }
  0xe4   : > { %v600_v47 = vmax.f32 %v550_v36, 0.0  ;;  %v598_v7 = vmax.f32 %v586_v62, 0.0 }
  0xe5   : > { %v615_v56 = vpack.c.bf16 %v599_v43, %v595_v42 }
  0xe6   : > { %v616_v60 = vpack.c.bf16 %v600_v47, %v596_v46 }
  0xe8   : > { %v568_v19 = vpop.f32.mrf.mxu2  ;;  %v533_v21 = vpop.f32.mrf.mxu0 }
  0xe9   : > { %v587_v20 = vpop.f32.mrf.mxu3  ;;  %v552_v22 = vpop.f32.mrf.mxu1  ;;  %v534_v25 = vadd.f32 %v533_v21, %v399_v17  ;;  %v569_v51 = vadd.f32 %v568_v19, %v394_v24 }
  0xea   : > { %v553_v27 = vadd.f32 %v552_v22, %v399_v17  ;;  %v588_v54 = vadd.f32 %v587_v20, %v394_v24  ;;  %v635_v16 = vpop.permute.xlu2 %634  ;;  %v640_v19 = vpop.permute.xlu0 %639 }
  0xeb   : > { %v603_v37 = vmax.f32 %v534_v25, 0.0  ;;  %v601_v1 = vmax.f32 %v569_v51, 0.0  ;;  %v1344_v22 = vpop.permute.xlu1 %644 }
  0xec   : > { %v604_v39 = vmax.f32 %v553_v27, 0.0  ;;  %v602_v3 = vmax.f32 %v588_v54, 0.0 }
  0xed   : > { %v617_v8 = vpack.c.bf16 %v601_v1, %v597_v6 }
  0xee   : > { %v618_v9 = vpack.c.bf16 %v602_v3, %v598_v7 }
  0xf0   : > { %v571_v26 = vpop.f32.mrf.mxu2  ;;  %v535_v29 = vpop.f32.mrf.mxu0 }
  0xf1   : > { %v590_v28 = vpop.f32.mrf.mxu3  ;;  %v536_v30 = vadd.f32 %v535_v29, %v404_v23  ;;  %v554_v31 = vpop.f32.mrf.mxu1  ;;  %v572_v44 = vadd.f32 %v571_v26, %v399_v17 }
  0xf2   : > { %v555_v34 = vadd.f32 %v554_v31, %v404_v23  ;;  %v591_v49 = vadd.f32 %v590_v28, %v399_v17  ;;  %v763_v29 = vpop.permute.xlu2 %762 }
  0xf3   : > { %v607_v38 = vmax.f32 %v536_v30, 0.0  ;;  %v605_v58 = vmax.f32 %v572_v44, 0.0  ;;  %v773_v44 = vpop.permute.xlu1 %772 }
  0xf4   : > { %v608_v40 = vmax.f32 %v555_v34, 0.0  ;;  %v606_v63 = vmax.f32 %v591_v49, 0.0 }
  0xf5   : > { %v619_v41 = vpack.c.bf16 %v607_v38, %v603_v37 }
  0xf6   : > { %v620_v45 = vpack.c.bf16 %v608_v40, %v604_v39  ;;  %v768_v39 = vpop.permute.xlu0 %767 }
  0xf7   : > { %670 = vmatpush.bf16.msrb.mxu0 %v619_v41 }
  0xf8   : > { %v573_v50 = vpop.f32.mrf.mxu2  ;;  %689 = vmatpush.bf16.msrb.mxu1 %v620_v45 }
  0xf9   : > { %v574_v52 = vadd.f32 %v573_v50, %v404_v23  ;;  %v592_v53 = vpop.f32.mrf.mxu3 }
  0xfa   : > { %v593_v55 = vadd.f32 %v592_v53, %v404_v23 }
  0xfb   : > { %v609_v59 = vmax.f32 %v574_v52, 0.0  ;;  %671 = vmatpush.bf16.msrb.mxu0 %v615_v56 }
  0xfc   : > { %v610_v0 = vmax.f32 %v593_v55, 0.0  ;;  %690 = vmatpush.bf16.msrb.mxu1 %v616_v60 }
  0xfd   : > { %v621_v2 = vpack.c.bf16 %v609_v59, %v605_v58 }
  0xfe   : > { %v622_v4 = vpack.c.bf16 %v610_v0, %v606_v63  ;;  %963 = vmatmul.msk.bf16.vlgmr.msrb.gmra.mxu0 %vm657_vm1, %v977_v61 }
  0xff   : > { %708 = vmatpush.bf16.msrb.mxu2 %v621_v2  ;;  %965 = vmatmul.msk.bf16.vlgmr.msrb.gmra.mxu1 %vm657_vm1, %v977_v61 }
 0x100   : > { %727 = vmatpush.bf16.msrb.mxu3 %v622_v4 }
 0x103   : > { %709 = vmatpush.bf16.msrb.mxu2 %v617_v8 }
 0x104   : > { %728 = vmatpush.bf16.msrb.mxu3 %v618_v9 }
 0x106   : > { %967 = vmatmul.msk.bf16.vlgmr.msrb.gmra.mxu2 %vm657_vm1, %v977_v61 }
 0x107   : > { %969 = vmatmul.msk.bf16.vlgmr.msrb.gmra.mxu3 %vm657_vm1, %v977_v61 }
 0x10e   : > { %964 = vmatmul.msk.bf16.gmra.mxu0 %vm657_vm1, %v978_v11 }
 0x10f   : > { %966 = vmatmul.msk.bf16.gmra.mxu1 %vm657_vm1, %v978_v11 }
 0x116   : > { %968 = vmatmul.msk.bf16.gmra.mxu2 %vm657_vm1, %v978_v11 }
 0x117   : > { %970 = vmatmul.msk.bf16.gmra.mxu3 %vm657_vm1, %v978_v11 }
 0x135   : > { %v778_v56 = vpop.permute.xlu2 %777 }
 0x17b   : > { %v673_v14 = vpop.f32.mrf.mxu0 }
 0x17c   : > { %v692_v15 = vpop.f32.mrf.mxu1  ;;  %v674_v26 = vadd.f32 %v673_v14, %v630_v13 }
 0x17d   : > { %v693_v23 = vadd.f32 %v692_v15, %v630_v13 }
 0x17e   : > { %v740_v34 = vmax.f32 %v674_v26, 0.0 }
 0x17f   : > { %v741_v32 = vmax.f32 %v693_v23, 0.0 }
 0x180   : > { %v780_v46 = vmul.f32 %v763_v29, %v740_v34 }
 0x181   : > { %v781_v42 = vmul.f32 %v763_v29, %v741_v32 }
 0x183   : > { %v675_v17 = vpop.f32.mrf.mxu0 }
 0x184   : > { %v694_v18 = vpop.f32.mrf.mxu1  ;;  %v676_v27 = vadd.f32 %v675_v17, %v635_v16 }
 0x185   : > { %v695_v24 = vadd.f32 %v694_v18, %v635_v16 }
 0x186   : > { %v744_v35 = vmax.f32 %v676_v27, 0.0 }
 0x187   : > { %v745_v33 = vmax.f32 %v695_v24, 0.0 }
 0x188   : > { %v784_v45 = vmul.f32 %v768_v39, %v744_v35 }
 0x189   : > { %v711_v20 = vpop.f32.mrf.mxu2  ;;  %v785_v41 = vmul.f32 %v768_v39, %v745_v33 }
 0x18a   : > { %v730_v21 = vpop.f32.mrf.mxu3  ;;  %v796_v57 = vadd.f32 %v784_v45, %v780_v46  ;;  %v712_v61 = vadd.f32 %v711_v20, %v630_v13 }
 0x18b   : > { %v678_v25 = vpop.f32.mrf.mxu0  ;;  %v805_v53 = vadd.f32 %v785_v41, %v781_v42  ;;  %v731_v2 = vadd.f32 %v730_v21, %v630_v13 }
 0x18c   : > { %v697_v28 = vpop.f32.mrf.mxu1  ;;  %v679_v31 = vadd.f32 %v678_v25, %v640_v19  ;;  %v742_v9 = vmax.f32 %v712_v61, 0.0 }
 0x18d   : > { %v698_v30 = vadd.f32 %v697_v28, %v640_v19  ;;  %v743_v12 = vmax.f32 %v731_v2, 0.0 }
 0x18e   : > { %v748_v40 = vmax.f32 %v679_v31, 0.0  ;;  %v782_v23 = vmul.f32 %v763_v29, %v742_v9 }
 0x18f   : > { %v749_v37 = vmax.f32 %v698_v30, 0.0 }
 0x190   : > { %v788_v51 = vmul.f32 %v773_v44, %v748_v40 }
 0x191   : > { %v713_v36 = vpop.f32.mrf.mxu2  ;;  %v789_v49 = vmul.f32 %v773_v44, %v749_v37 }
 0x192   : > { %v732_v38 = vpop.f32.mrf.mxu3  ;;  %v714_v54 = vadd.f32 %v713_v36, %v635_v16  ;;  %v797_v3 = vadd.f32 %v796_v57, %v788_v51 }
 0x193   : > { %v680_v43 = vpop.f32.mrf.mxu0  ;;  %v733_v58 = vadd.f32 %v732_v38, %v635_v16  ;;  %v806_v62 = vadd.f32 %v805_v53, %v789_v49 }
 0x194   : > { %v681_v47 = vadd.f32 %v680_v43, %v1344_v22  ;;  %v699_v48 = vpop.f32.mrf.mxu1  ;;  %v746_v5 = vmax.f32 %v714_v54, 0.0 }
 0x195   : > { %v700_v50 = vadd.f32 %v699_v48, %v1344_v22  ;;  %v747_v7 = vmax.f32 %v733_v58, 0.0 }
 0x196   : > { %v752_v52 = vmax.f32 %v681_v47, 0.0  ;;  %v786_v15 = vmul.f32 %v768_v39, %v746_v5 }
 0x197   : > { %v753_v55 = vmax.f32 %v700_v50, 0.0  ;;  %v787_v17 = vmul.f32 %v768_v39, %v747_v7  ;;  %v833_v50 = vstv %s832_s21 }
 0x198   : > { %v792_v59 = vmul.f32 %v778_v56, %v752_v52  ;;  %v814_v28 = vadd.f32 %v786_v15, %v782_v23 }
 0x199   : > { %v716_v60 = vpop.f32.mrf.mxu2  ;;  %v793_v63 = vmul.f32 %v778_v56, %v753_v55 }
 0x19a   : > { %v717_v0 = vadd.f32 %v716_v60, %v640_v19  ;;  %v735_v1 = vpop.f32.mrf.mxu3  ;;  %v798_v8 = vadd.f32 %v797_v3, %v792_v59  ;;  %v852_v60 = vlaneseq }
 0x19b   : > { %v736_v4 = vadd.f32 %v735_v1, %v640_v19  ;;  %v807_v6 = vadd.f32 %v806_v62, %v793_v63  ;;  %v783_v19 = vmul.f32 %v763_v29, %v743_v12 }
 0x19c   : > { %v750_v11 = vmax.f32 %v717_v0, 0.0  ;;  %v799_v18 = vrot.slane %v798_v8, 4  ;;  %vm854_vm5 = vcmp.lt.s32.totalorder %v852_v60, 512 }
 0x19d   : > { %v808_v10 = vrot.slane %v807_v6, 4  ;;  %v751_v14 = vmax.f32 %v736_v4, 0.0  ;;  %v823_v31 = vadd.f32 %v787_v17, %v783_v19 }
 0x19e   : > { %v790_v24 = vmul.f32 %v773_v44, %v750_v11  ;;  %v800_v32 = vadd.f32 %v799_v18, %v798_v8 }
 0x19f   : > { %v809_v16 = vadd.f32 %v808_v10, %v807_v6  ;;  %v791_v26 = vmul.f32 %v773_v44, %v751_v14 }
 0x1a0   : > { %v815_v34 = vadd.f32 %v814_v28, %v790_v24  ;;  %v801_v40 = vrot.slane %v800_v32, 2 }
 0x1a1   : > { %v718_v20 = vpop.f32.mrf.mxu2  ;;  %v810_v25 = vrot.slane %v809_v16, 2  ;;  %v824_v37 = vadd.f32 %v823_v31, %v791_v26 }
 0x1a2   : > { %v719_v13 = vadd.f32 %v718_v20, %v1344_v22  ;;  %v737_v21 = vpop.f32.mrf.mxu3  ;;  %v802_v44 = vadd.f32 %v801_v40, %v800_v32 }
 0x1a3   : > { %v738_v27 = vadd.f32 %v737_v21, %v1344_v22  ;;  %v811_v36 = vadd.f32 %v810_v25, %v809_v16 }
 0x1a4   : > { %v754_v30 = vmax.f32 %v719_v13, 0.0  ;;  %v803_v51 = vrot.slane %v802_v44, 1 }
 0x1a5   : > { %v755_v33 = vmax.f32 %v738_v27, 0.0  ;;  %v812_v42 = vrot.slane %v811_v36, 1 }
 0x1a6   : > { %v794_v35 = vmul.f32 %v778_v56, %v754_v30  ;;  %v804_v57 = vadd.f32 %v803_v51, %v802_v44 }
 0x1a7   : > { %v795_v38 = vmul.f32 %v778_v56, %v755_v33  ;;  %v813_v47 = vadd.f32 %v812_v42, %v811_v36 }
 0x1a8   : > { %v816_v39 = vadd.f32 %v815_v34, %v794_v35  ;;  %v834_v0 = vadd.f32 %v833_v50, %v804_v57 }
 0x1a9   : > { %v825_v41 = vadd.f32 %v824_v37, %v795_v38  ;;  %v835_v55 = vadd.f32 %v833_v50, %v813_v47 }
 0x1aa   : > { %v817_v29 = vrot.slane %v816_v39, 4 }
 0x1ab   : > { %v826_v22 = vrot.slane %v825_v41, 4  ;;  %v842_v62 = vrot.slane %v835_v55, 7 }
 0x1ac   : > { %v818_v43 = vadd.f32 %v817_v29, %v816_v39 }
 0x1ad   : > { %v827_v45 = vadd.f32 %v826_v22, %v825_v41  ;;  %v846_v2 = vsel %vm845_vm2, %v834_v0, %v842_v62 }
 0x1ae   : > { %v819_v46 = vrot.slane %v818_v43, 2 }
 0x1af   : > { %v828_v48 = vrot.slane %v827_v45, 2 }
 0x1b0   : > { %v820_v49 = vadd.f32 %v819_v46, %v818_v43 }
 0x1b1   : > { %v829_v52 = vadd.f32 %v828_v48, %v827_v45 }
 0x1b2   : > { %v821_v53 = vrot.slane %v820_v49, 1 }
 0x1b3   : > { %v830_v54 = vrot.slane %v829_v52, 1 }
 0x1b4   : > { %v822_v56 = vadd.f32 %v821_v53, %v820_v49 }
 0x1b5   : > { %v831_v58 = vadd.f32 %v830_v54, %v829_v52 }
 0x1b6   : > { %v836_v59 = vadd.f32 %v833_v50, %v822_v56 }
 0x1b7   : > { %v837_v61 = vadd.f32 %v833_v50, %v831_v58 }
 0x1b8   : > { %v843_v63 = vrot.slane %v836_v59, 6 }
 0x1b9   : > { %v844_v1 = vrot.slane %v837_v61, 5 }
 0x1bb   : > { %v848_v3 = vsel %vm847_vm3, %v843_v63, %v844_v1 }
 0x1bc   : > { %v850_v4 = vsel %vm849_vm4, %v846_v2, %v848_v3 }
 0x1bd   : > { %856 = vst.msk [vmem:[%s273_s10] sm:$0xf] %vm854_vm5, %v850_v4 }
 0x1be   : > { %1049 = shalt.err (!%p1046_p3)
}
 0x1bf   : > { %979 = dma.vmem_to_hbm [thread:$0]  (%p1168_p5), %s871_s14, 64, %s873_s6, %s858_s15  }
 0x1c0 PF: > { %p985_p4 = scmp.ge.s32.totalorder %s1084_s29, 2  ;;  %s884_s22 = sand.u32 1, %s1072_s26  }
 0x1c1   : > { %s885_s24 = scalar_lea.sflag [#allocation4], %s884_s22 }
 0x1c2   : > { %p982_p7 = pnand %p985_p4, %p1172_p6 }
 0x1c4   : > { %p983_p8 = pneg %p982_p7 }
 0x1c6   : > { %1067 = dma.done.wait (%p983_p8), %s885_s24, 64  }
 0x1c7   : > { %1069 = vsyncadd (%p983_p8), %s885_s24, 4294967232  ;;  %p18_p9 = scmp.ge.s32.totalorder %s1155_s8, 4   ;;  %s1396_s26 = smov %s1076_s27 }
 0x1c8   : > { %s1397_s27 = smov %s1080_s28  ;;  %s1398_s28 = smov %s1166_s11 }
 0x1c9   : > { %s1399_s29 = smov %s1155_s8  ;;  %20 = sbr.rel (!%p18_p9) target bundleno = 5 (0x5), region = 83 }
 0x1ce   :  { %891 = vsyncpa [#allocation4], 1 }
 0x1cf   :  { %893 = vsyncpa [#allocation4 + $0x1], 1 }

</bundles_post_ra>
